<compile_context>
chip_gen: v5e
topology: v5e:2x2
jax: 0.10.0
libtpu: 0.0.40
codegen_flags: <defaults>
</compile_context>

<pallas_src>
import functools

import jax
import jax.numpy as jnp
from jax.experimental import pallas as pl
from jax.experimental.pallas import tpu as pltpu

_MiB = 1024 * 1024


def _round_up(x, m):
    return ((x + m - 1) // m) * m


def _tpu_vmem_capacity_bytes():
    """Physical VMEM per TensorCore (fallback: 128 MiB parts)."""
    try:
        return int(pltpu.get_tpu_info().vmem_capacity_bytes)
    except Exception:
        return 128 * _MiB


def _pick_weight_col_tile(H, dtype_bytes, budget, tnw_max=2048):
    """Column tile TNw for the streamed [H, TNw] ResBlock weight slab."""
    if H <= tnw_max or H <= 128:
        return H
    # Two streamed weight buffers should use at most ~half of the VMEM budget.
    cap = (budget // 2) // (2 * H * dtype_bytes)
    tnw = max(128, min(tnw_max, (cap // 128) * 128))
    while tnw > 128 and H % tnw != 0:
        tnw -= 128
    return tnw if H % tnw == 0 else H


def _pick_vocab_tile(V, H, dtype_bytes, budget, tn_max, prefer_even_tiles):
    """Vocab tile TN for the streamed [H, TN] w_out slab."""
    tn = min(tn_max, _round_up(V, 128))
    # Three streamed buffers should use at most ~60% of the VMEM budget.
    while tn > 512 and 3 * H * tn * dtype_bytes > int(budget * 0.6):
        tn //= 2
    tn = max(128, (tn // 128) * 128)
    # v7x: prefer an even tile count so the two TensorCores split the grid evenly.
    n_tiles = pl.cdiv(V, tn)
    if prefer_even_tiles and n_tiles > 1 and n_tiles % 2 == 1 and tn >= 1024:
        if pl.cdiv(V, tn // 2) % 2 == 0:
            tn //= 2
    return tn


def _streamed_spec(block_shape, index_map, nbuf):
    """BlockSpec for a streamed weight slab; request deeper buffering if useful."""
    if nbuf > 2:
        try:
            return pl.BlockSpec(block_shape, index_map, pipeline_mode=pl.Buffered(nbuf))
        except Exception:  # older jax without pipeline_mode / Buffered
            pass
    return pl.BlockSpec(block_shape, index_map)


# ----------------------------------------------------------------------------
# Stage 1: ResBlock chain, column-tiled layer weights.
#   grid = (L, H // TNw); h carried in f32 VMEM scratch; per-slab SiLU deltas in
#   a second scratch, folded into h at the last column tile of each layer.
# ----------------------------------------------------------------------------
def _resblock_kernel(x_ref, w_ref, b_ref, h_out_ref, h_acc, d_acc, *, col_tile):
    """x_ref: [S,H]; w_ref: [1,H,TNw] ([in,out] slab); b_ref: [1,1,TNw];
    h_out_ref: [S,H]; h_acc: f32 [S,H]; d_acc: f32 [H//TNw, S, TNw]."""
    l = pl.program_id(0)
    j = pl.program_id(1)
    n_l = pl.num_programs(0)
    n_j = pl.num_programs(1)

    @pl.when(jnp.logical_and(l == 0, j == 0))
    def _():
        h_acc[...] = x_ref[...].astype(jnp.float32)

    w = w_ref[0]                                           # [H, TNw] native dtype (bf16 on MXU)
    h = h_acc[...]                                         # [S, H] f32 running activation
    y = jnp.dot(h.astype(w.dtype), w, preferred_element_type=jnp.float32)
    y = y + b_ref[0].astype(jnp.float32)                   # [S, TNw]
    d_acc[j] = y * jax.nn.sigmoid(y)                       # SiLU slab; sigmoid -> EUP

    @pl.when(j == n_j - 1)                                 # end of layer: fold residual
    def _():
        for jj in range(d_acc.shape[0]):                   # static unroll, static slices
            lo, hi = jj * col_tile, (jj + 1) * col_tile
            h_acc[:, lo:hi] = h_acc[:, lo:hi] + d_acc[jj]

    @pl.when(jnp.logical_and(l == n_l - 1, j == n_j - 1))
    def _():
        h_out_ref[...] = h_acc[...].astype(h_out_ref.dtype)


# ----------------------------------------------------------------------------
# Stage 2: output projection h @ W_out, tiled/pipelined over the vocab dim.
# ----------------------------------------------------------------------------
def _out_proj_kernel(h_ref, w_ref, o_ref):
    """h_ref: [S,H] resident (already in matmul dtype); w_ref: [H,TN] streamed;
    o_ref: [S,TN]."""
    w = w_ref[...]
    h = h_ref[...]
    if h.dtype != w.dtype:                                 # static; normally a no-op
        h = h.astype(w.dtype)
    o_ref[...] = jnp.dot(h, w, preferred_element_type=jnp.float32).astype(o_ref.dtype)


# ----------------------------------------------------------------------------
# One-time (model-load-time) weight prep: tile selection + w_out pre-padding.
# ----------------------------------------------------------------------------
def prepare_medusa_weights(w_blocks, b_blocks, w_out, *, tn_max=2048, tnw_max=2048):
    """w_blocks: [L,H,H] ([in,out]); b_blocks: [L,1,H]; w_out: [H,V] ([in,out]).
    Returns (w_blocks, b_blocks, w_out_padded, cfg) with cfg holding the static
    kwargs for medusa_head.  Run once at load time, never per forward."""
    H, V = w_out.shape
    cap = _tpu_vmem_capacity_bytes()
    # Leave ~15% headroom for Mosaic internals / output buffers; never claim
    # more than ~110 MiB on 128 MiB parts.  v7x (64 MiB) lands at ~54 MiB.
    budget = max(32 * _MiB, min(int(cap * 0.85), 110 * _MiB))
    two_cores = cap <= 72 * _MiB                            # v7x-like part

    tn = _pick_vocab_tile(V, H, jnp.dtype(w_out.dtype).itemsize, budget, tn_max,
                          prefer_even_tiles=two_cores)
    v_pad = _round_up(V, tn)
    if v_pad != V:
        w_out = jnp.pad(w_out, ((0, 0), (0, v_pad - V)))    # once, at load time

    tnw = _pick_weight_col_tile(H, jnp.dtype(w_blocks.dtype).itemsize, budget, tnw_max)

    cfg = dict(vocab_size=int(V), tn=int(tn), tnw=int(tnw), vmem_limit=int(budget))
    return w_blocks, b_blocks, w_out, cfg


# ----------------------------------------------------------------------------
# Forward pass.
# ----------------------------------------------------------------------------
@functools.partial(jax.jit,
                   static_argnames=("vocab_size", "tn", "tnw", "vmem_limit", "trim_output"))
def medusa_head(x, w_blocks, b_blocks, w_out_padded, *,
                vocab_size, tn, tnw, vmem_limit, trim_output=True):
    """x: [S,H]; w_blocks: [L,H,H] ([in,out]); b_blocks: [L,1,H];
    w_out_padded: [H, V_pad] ([in,out], pre-padded to a multiple of tn)."""
    S, H = x.shape
    L = w_blocks.shape[0]
    v_pad = w_out_padded.shape[1]
    mm_dtype = w_out_padded.dtype          # Stage-1 emits h in the matmul dtype
    out_dtype = x.dtype

    # ---- Stage 1: residual blocks (tiny FLOPs, weight-DMA bound) ----
    if L == 0:
        h = x.astype(mm_dtype)
    else:
        n_j = H // tnw
        w_bytes = jnp.dtype(w_blocks.dtype).itemsize
        nbuf_w = 3 if (L * n_j >= 3 and 3 * H * tnw * w_bytes <= int(vmem_limit * 0.6)) else 2
        h = pl.pallas_call(
            functools.partial(_resblock_kernel, col_tile=tnw),
            out_shape=jax.ShapeDtypeStruct((S, H), mm_dtype),
            grid=(L, n_j),
            in_specs=[
                pl.BlockSpec((S, H), lambda l, j: (0, 0)),              # x resident
                _streamed_spec((1, H, tnw), lambda l, j: (l, 0, j), nbuf_w),  # weight column slab
                pl.BlockSpec((1, 1, tnw), lambda l, j: (l, 0, j)),      # bias slab
            ],
            out_specs=pl.BlockSpec((S, H), lambda l, j: (0, 0)),
            scratch_shapes=[
                pltpu.VMEM((S, H), jnp.float32),            # running activation h
                pltpu.VMEM((n_j, S, tnw), jnp.float32),     # per-layer SiLU deltas
            ],
            compiler_params=pltpu.CompilerParams(
                dimension_semantics=("arbitrary", "arbitrary"),  # sequential (carried scratch)
                vmem_limit_bytes=vmem_limit,
            ),
        )(x, w_blocks, b_blocks)

    # ---- Stage 2: vocab-tiled output projection (pure weight-BW) ----
    n_tiles = v_pad // tn
    o_bytes = jnp.dtype(mm_dtype).itemsize
    nbuf_o = 3 if (n_tiles >= 3 and 3 * H * tn * o_bytes <= int(vmem_limit * 0.6)) else 2
    logits = pl.pallas_call(
        _out_proj_kernel,
        out_shape=jax.ShapeDtypeStruct((S, v_pad), out_dtype),
        grid=(n_tiles,),
        in_specs=[
            pl.BlockSpec((S, H), lambda j: (0, 0)),          # h resident across all vocab tiles
            _streamed_spec((H, tn), lambda j: (0, j), nbuf_o),  # w_out tiles stream
        ],
        out_specs=pl.BlockSpec((S, tn), lambda j: (0, j)),
        compiler_params=pltpu.CompilerParams(
            dimension_semantics=("parallel",),               # megacore-shard vocab tiles (v7x)
            vmem_limit_bytes=vmem_limit,
        ),
    )(h, w_out_padded)

    if trim_output and vocab_size != v_pad:
        logits = logits[:, :vocab_size]
    return logits


def medusa_head_ref(x, w_blocks, b_blocks, w_out):
    h = x.astype(jnp.float32)
    for l in range(w_blocks.shape[0]):
        y = h @ w_blocks[l].astype(jnp.float32) + b_blocks[l].astype(jnp.float32)
        h = h + y * jax.nn.sigmoid(y)
    return (h @ w_out.astype(jnp.float32)).astype(x.dtype)


if __name__ == "__main__":
    # --- Test 1: f32, small shapes consistent with the module's forward ---
    S, H, V = 8, 32, 64
    L = 2  # medusa_num_layers

    key = jax.random.PRNGKey(0)
    kx, kw, kb, ko = jax.random.split(key, 4)

    x = jax.random.normal(kx, (S, H), dtype=jnp.float32)
    # PyTorch Linear weight is [out, in]; we materialize directly in [in, out]
    # layout (equivalent to .T) for the kernel's row-major matmuls.
    w_blocks = jax.random.normal(kw, (L, H, H), dtype=jnp.float32) * 0.05
    b_blocks = jax.random.normal(kb, (L, 1, H), dtype=jnp.float32) * 0.05
    w_out = jax.random.normal(ko, (H, V), dtype=jnp.float32) * 0.05

    w_p, b_p, wo_p, cfg = prepare_medusa_weights(w_blocks, b_blocks, w_out)
    out = jax.block_until_ready(medusa_head(x, w_p, b_p, wo_p, **cfg))
    ref = medusa_head_ref(x, w_blocks, b_blocks, w_out)
    assert out.shape == (S, V), out.shape
    assert jnp.allclose(out, ref, atol=1e-5, rtol=1e-5), "f32 mismatch vs reference"

    # --- Test 2: bf16 weights + forced Stage-1 column tiling (n_j > 1) ---
    S2, H2, V2, L2 = 8, 256, 384, 2
    keys2 = jax.random.split(jax.random.PRNGKey(0), 8)
    x2 = jax.random.normal(keys2[4], (S2, H2), dtype=jnp.float32).astype(jnp.bfloat16)
    w2 = (jax.random.normal(keys2[5], (L2, H2, H2), dtype=jnp.float32) * 0.03).astype(jnp.bfloat16)
    b2 = (jax.random.normal(keys2[6], (L2, 1, H2), dtype=jnp.float32) * 0.03).astype(jnp.bfloat16)
    wo2 = (jax.random.normal(keys2[7], (H2, V2), dtype=jnp.float32) * 0.03).astype(jnp.bfloat16)

    w2_p, b2_p, wo2_p, cfg2 = prepare_medusa_weights(w2, b2, wo2, tn_max=256, tnw_max=128)
    out2 = jax.block_until_ready(medusa_head(x2, w2_p, b2_p, wo2_p, **cfg2))
    ref2 = medusa_head_ref(x2, w2, b2, wo2)
    assert out2.shape == (S2, V2), out2.shape
    assert jnp.allclose(out2.astype(jnp.float32), ref2.astype(jnp.float32),
                        atol=3e-2, rtol=3e-2), "bf16 mismatch vs reference"

    print("KERNEL_OK")
</pallas_src>

<mosaic_0001>
module attributes {stable_mosaic.version = 11 : i64} {
  func.func @_out_proj_kernel(%arg0: i32, %arg1: memref<8x32xf32, #tpu.memory_space<vmem>>, %arg2: memref<32x128xf32, #tpu.memory_space<vmem>>, %arg3: memref<8x128xf32, #tpu.memory_space<vmem>>) attributes {dimension_semantics = [#tpu.dimension_semantics<parallel>], iteration_bounds = array<i64: 1>, scalar_prefetch = 0 : i64, scratch_operands = 0 : i64, tpu.core_type = #tpu.core_type<tc>, window_params = [{pipeline_mode = #tpu.pipeline_mode<synchronous>, transform_indices = @transform_0, window_bounds = array<i64: 8, 32>}, {transform_indices = @transform_1, window_bounds = array<i64: 32, 128>}, {transform_indices = @transform_2, window_bounds = array<i64: 8, 128>}]} {
    %c0 = arith.constant 0 : index
    %c0_0 = arith.constant 0 : index
    %0 = vector.load %arg2[%c0, %c0_0] : memref<32x128xf32, #tpu.memory_space<vmem>>, vector<32x128xf32>
    %c0_1 = arith.constant 0 : index
    %c0_2 = arith.constant 0 : index
    %1 = vector.load %arg1[%c0_1, %c0_2] : memref<8x32xf32, #tpu.memory_space<vmem>>, vector<8x32xf32>
    %cst = arith.constant dense<0.000000e+00> : vector<8x128xf32>
    %2 = tpu.matmul %1, %0, %cst {dimension_numbers = #tpu.dot_dimension_numbers<[1], [0], [0], [1], [0, 0, 1, 1], [], []>} : vector<8x32xf32>, vector<32x128xf32>, vector<8x128xf32> -> vector<8x128xf32>
    %c0_3 = arith.constant 0 : index
    %c0_4 = arith.constant 0 : index
    %3 = vector.load %arg3[%c0_3, %c0_4] : memref<8x128xf32, #tpu.memory_space<vmem>>, vector<8x128xf32>
    tpu.vector_store %arg3[%c0_3, %c0_4], %2 {strides = array<i32>} : memref<8x128xf32, #tpu.memory_space<vmem>>, vector<8x128xf32>,
    return
  }
  func.func @transform_0(%arg0: i32) -> (i32, i32) {
    %c0_i32 = arith.constant 0 : i32
    %c0_i32_0 = arith.constant 0 : i32
    %c0_i32_1 = arith.constant 0 : i32
    return %c0_i32, %c0_i32_0 : i32, i32
  }
  func.func @transform_1(%arg0: i32) -> (i32, i32) {
    %c0_i32 = arith.constant 0 : i32
    %c0_i32_0 = arith.constant 0 : i32
    return %c0_i32, %arg0 : i32, i32
  }
  func.func @transform_2(%arg0: i32) -> (i32, i32) {
    %c0_i32 = arith.constant 0 : i32
    %c0_i32_0 = arith.constant 0 : i32
    return %c0_i32, %arg0 : i32, i32
  }
}

module attributes {stable_mosaic.version = 11 : i64} {
  func.func @_resblock_kernel(%arg0: i32, %arg1: i32, %arg2: memref<8x32xf32, #tpu.memory_space<vmem>>, %arg3: memref<1x32x32xf32, #tpu.memory_space<vmem>>, %arg4: memref<1x1x32xf32, #tpu.memory_space<vmem>>, %arg5: memref<8x32xf32, #tpu.memory_space<vmem>>, %arg6: memref<8x32xf32, #tpu.memory_space<vmem>>, %arg7: memref<1x8x32xf32, #tpu.memory_space<vmem>>) attributes {dimension_semantics = [#tpu.dimension_semantics<arbitrary>, #tpu.dimension_semantics<arbitrary>], iteration_bounds = array<i64: 2, 1>, scalar_prefetch = 0 : i64, scratch_operands = 2 : i64, tpu.core_type = #tpu.core_type<tc>, window_params = [{pipeline_mode = #tpu.pipeline_mode<synchronous>, transform_indices = @transform_0, window_bounds = array<i64: 8, 32>}, {transform_indices = @transform_1, window_bounds = array<i64: 1, 32, 32>}, {transform_indices = @transform_2, window_bounds = array<i64: 1, 1, 32>}, {pipeline_mode = #tpu.pipeline_mode<synchronous>, transform_indices = @transform_3, window_bounds = array<i64: 8, 32>}]} {
    %c0_i32 = arith.constant 0 : i32
    %0 = arith.cmpi eq, %arg0, %c0_i32 : i32
    %c0_i32_0 = arith.constant 0 : i32
    %1 = arith.cmpi eq, %arg1, %c0_i32_0 : i32
    %2 = arith.andi %0, %1 : i1
    %3 = arith.extui %2 : i1 to i32
    %c0_i32_1 = arith.constant 0 : i32
    %4 = arith.cmpi ne, %3, %c0_i32_1 : i32
    scf.if %4 {
      %c0_16 = arith.constant 0 : index
      %c0_17 = arith.constant 0 : index
      %31 = vector.load %arg2[%c0_16, %c0_17] : memref<8x32xf32, #tpu.memory_space<vmem>>, vector<8x32xf32>
      %c0_18 = arith.constant 0 : index
      %c0_19 = arith.constant 0 : index
      %32 = vector.load %arg6[%c0_18, %c0_19] : memref<8x32xf32, #tpu.memory_space<vmem>>, vector<8x32xf32>
      tpu.vector_store %arg6[%c0_18, %c0_19], %31 {strides = array<i32>} : memref<8x32xf32, #tpu.memory_space<vmem>>, vector<8x32xf32>,
    } else {
    }
    %c0 = arith.constant 0 : index
    %c0_2 = arith.constant 0 : index
    %c0_3 = arith.constant 0 : index
    %5 = vector.load %arg3[%c0, %c0_2, %c0_3] : memref<1x32x32xf32, #tpu.memory_space<vmem>>, vector<1x32x32xf32>
    %6 = vector.shape_cast %5 : vector<1x32x32xf32> to vector<32x32xf32>
    %c0_4 = arith.constant 0 : index
    %c0_5 = arith.constant 0 : index
    %7 = vector.load %arg6[%c0_4, %c0_5] : memref<8x32xf32, #tpu.memory_space<vmem>>, vector<8x32xf32>
    %cst = arith.constant dense<0.000000e+00> : vector<8x32xf32>
    %8 = tpu.matmul %7, %6, %cst {dimension_numbers = #tpu.dot_dimension_numbers<[1], [0], [0], [1], [0, 0, 1, 1], [], []>} : vector<8x32xf32>, vector<32x32xf32>, vector<8x32xf32> -> vector<8x32xf32>
    %c0_6 = arith.constant 0 : index
    %c0_7 = arith.constant 0 : index
    %c0_8 = arith.constant 0 : index
    %9 = vector.load %arg4[%c0_6, %c0_7, %c0_8] : memref<1x1x32xf32, #tpu.memory_space<vmem>>, vector<1x1x32xf32>
    %10 = vector.shape_cast %9 : vector<1x1x32xf32> to vector<1x32xf32>
    %11 = vector.broadcast %10 : vector<1x32xf32> to vector<8x32xf32>
    %12 = arith.addf %8, %11 : vector<8x32xf32>
    %13 = arith.negf %12 : vector<8x32xf32>
    %14 = math.exp %13 : vector<8x32xf32>
    %cst_9 = arith.constant 1.000000e+00 : f32
    %15 = vector.broadcast %cst_9 : f32 to vector<8x32xf32>
    %16 = arith.addf %15, %14 : vector<8x32xf32>
    %17 = arith.divf %15, %16 : vector<8x32xf32>
    %18 = arith.mulf %12, %17 : vector<8x32xf32>
    %19 = arith.index_cast %arg1 : i32 to index
    %c0_10 = arith.constant 0 : index
    %c0_11 = arith.constant 0 : index
    %20 = vector.load %arg7[%19, %c0_10, %c0_11] : memref<1x8x32xf32, #tpu.memory_space<vmem>>, vector<1x8x32xf32>
    %21 = vector.shape_cast %20 : vector<1x8x32xf32> to vector<8x32xf32>
    %22 = vector.shape_cast %18 : vector<8x32xf32> to vector<1x8x32xf32>
    tpu.vector_store %arg7[%19, %c0_10, %c0_11], %22 {strides = array<i32>} : memref<1x8x32xf32, #tpu.memory_space<vmem>>, vector<1x8x32xf32>,
    %c0_i32_12 = arith.constant 0 : i32
    %23 = arith.cmpi eq, %arg1, %c0_i32_12 : i32
    %24 = arith.extui %23 : i1 to i32
    %c0_i32_13 = arith.constant 0 : i32
    %25 = arith.cmpi ne, %24, %c0_i32_13 : i32
    scf.if %25 {
      %c0_16 = arith.constant 0 : index
      %c0_17 = arith.constant 0 : index
      %31 = vector.load %arg6[%c0_16, %c0_17] : memref<8x32xf32, #tpu.memory_space<vmem>>, vector<8x32xf32>
      %c0_18 = arith.constant 0 : index
      %c0_19 = arith.constant 0 : index
      %c0_20 = arith.constant 0 : index
      %32 = vector.load %arg7[%c0_18, %c0_19, %c0_20] : memref<1x8x32xf32, #tpu.memory_space<vmem>>, vector<1x8x32xf32>
      %33 = vector.shape_cast %32 : vector<1x8x32xf32> to vector<8x32xf32>
      %34 = arith.addf %31, %33 : vector<8x32xf32>
      %c0_21 = arith.constant 0 : index
      %c0_22 = arith.constant 0 : index
      %35 = vector.load %arg6[%c0_21, %c0_22] : memref<8x32xf32, #tpu.memory_space<vmem>>, vector<8x32xf32>
      tpu.vector_store %arg6[%c0_21, %c0_22], %34 {strides = array<i32>} : memref<8x32xf32, #tpu.memory_space<vmem>>, vector<8x32xf32>,
    } else {
    }
    %c1_i32 = arith.constant 1 : i32
    %26 = arith.cmpi eq, %arg0, %c1_i32 : i32
    %c0_i32_14 = arith.constant 0 : i32
    %27 = arith.cmpi eq, %arg1, %c0_i32_14 : i32
    %28 = arith.andi %26, %27 : i1
    %29 = arith.extui %28 : i1 to i32
    %c0_i32_15 = arith.constant 0 : i32
    %30 = arith.cmpi ne, %29, %c0_i32_15 : i32
    scf.if %30 {
      %c0_16 = arith.constant 0 : index
      %c0_17 = arith.constant 0 : index
      %31 = vector.load %arg6[%c0_16, %c0_17] : memref<8x32xf32, #tpu.memory_space<vmem>>, vector<8x32xf32>
      %c0_18 = arith.constant 0 : index
      %c0_19 = arith.constant 0 : index
      %32 = vector.load %arg5[%c0_18, %c0_19] : memref<8x32xf32, #tpu.memory_space<vmem>>, vector<8x32xf32>
      tpu.vector_store %arg5[%c0_18, %c0_19], %31 {strides = array<i32>} : memref<8x32xf32, #tpu.memory_space<vmem>>, vector<8x32xf32>,
    } else {
    }
    return
  }
  func.func @transform_0(%arg0: i32, %arg1: i32) -> (i32, i32) {
    %c0_i32 = arith.constant 0 : i32
    %c0_i32_0 = arith.constant 0 : i32
    %c0_i32_1 = arith.constant 0 : i32
    return %c0_i32, %c0_i32_0 : i32, i32
  }
  func.func @transform_1(%arg0: i32, %arg1: i32) -> (i32, i32, i32) {
    %c0_i32 = arith.constant 0 : i32
    %c0_i32_0 = arith.constant 0 : i32
    return %arg0, %c0_i32, %arg1 : i32, i32, i32
  }
  func.func @transform_2(%arg0: i32, %arg1: i32) -> (i32, i32, i32) {
    %c0_i32 = arith.constant 0 : i32
    %c0_i32_0 = arith.constant 0 : i32
    return %arg0, %c0_i32, %arg1 : i32, i32, i32
  }
  func.func @transform_3(%arg0: i32, %arg1: i32) -> (i32, i32) {
    %c0_i32 = arith.constant 0 : i32
    %c0_i32_0 = arith.constant 0 : i32
    %c0_i32_1 = arith.constant 0 : i32
    return %c0_i32, %c0_i32_0 : i32, i32
  }
}

</mosaic_0001>

<bundles_post_ra>
// kernel: medusa_head.2
= control target key start
LH: loop header
LB: loop body
LE: loop exit
PB: predicated region body
PF: predicated region fallthrough
CT: control target
= control target key end

     0   :  { %8 = vsyncpa [#allocation5], 0  ;;  %s808_s0 = inlined_call_operand.hbm [shape: f32[8,32], index: 0, kind: input, shape index: {}]   ;;  %s809_s1 = inlined_call_operand.hbm [shape: f32[2,32,32], index: 1, kind: input, shape index: {}]   ;;  %s810_s2 = inlined_call_operand.hbm [shape: f32[2,1,32], index: 2, kind: input, shape index: {}]   ;;  %s811_s3 = inlined_call_operand.vmem [shape: f32[8,32], index: 3, kind: output, shape index: {}]  }
   0x1   :  { %9 = vsyncpa [#allocation7], 0 }
   0x2   :  { %11 = vsyncpa [#allocation7 + $0x1], 0  ;;  %s669_s12 = smov 0   ;;  %s671_s13 = smov 0  }
   0x3   :  { %s673_s14 = smov 0   ;;  %s675_s15 = smov 0  }
   0x4   :  { %s677_s16 = smov 0   ;;  %s679_s17 = smov 0  }
   0x5 LB: > { %s29_s18 = sadd.s32 1, %s640_s16  ;;  %s59_s19 = sadd.s32 1, %s632_s14  ;;  %s644_s17 = sphi %s679_s17, %s17_s17   ;;  %s640_s16 = sphi %s677_s16, %s821_s16   ;;  %s636_s15 = sphi %s675_s15, %s820_s15   ;;  %s632_s14 = sphi %s673_s14, %s819_s14   ;;  %s628_s13 = sphi %s671_s13, %s818_s13   ;;  %s624_s12 = sphi %s669_s12, %s817_s12  }
   0x6   : > { %p31_p0 = scmp.ge.s32.totalorder %s29_s18, 2  ;;  %p66_p1 = scmp.ne.s32.totalorder %s632_s14, %s628_s13 }
   0x7   : > { %p67_p2 = scmp.eq.s32.totalorder %s644_s17, 0  ;;  %p442_p4 = scmp.lt.s32.totalorder %s644_s17, 2 }
   0x8   : > { %s823_s18 = smov (%p31_p0, %s29_s18), 0  ;;  %s157_s22 = sand.u32 1, %s644_s17  }
   0x9   : > { %p706_p3 = por %p67_p2, %p66_p1  ;;  %s54_s21 = ssub.s32 %s640_s16, %s823_s18 }
   0xa   : > { %p57_p5 = scmp.eq.s32.totalorder %s54_s21, 0  ;;  %s159_s23 = sand.u32 1, %s632_s14  }
   0xb   : > { %s419_s24 = sshll.u32 %s640_s16, 5  ;;  %s407_s26 = sshll.u32 %s159_s23, 5 }
   0xc   : > { %s717_s25 = scalar_select %p57_p5, %s632_s14, %s59_s19  }
   0xd   : > { %s167_s29 = scalar_lea.hbm %s809_s1, %s419_s24  ;;  %s161_s4 = scalar_lea.vmem [#allocation6], %s407_s26 }
   0xe   : > { %s168_s30 = sshll.u32 %s167_s29, 4  ;;  %s170_s5 = sshll.u32 %s161_s4, 4  ;;  %s169_s30 = int_to_ptr.hbm [resolvable:$true] %s168_s30  ;;  %s171_s5 = int_to_ptr.vmem [resolvable:$true] %s170_s5 }
   0xf   : > { %p728_p6 = pnand %p442_p4, %p706_p3  ;;  %s158_s7 = scalar_lea.sflag [#allocation7], %s157_s22 }
  0x10   : > { %s646_s8 = smov 128   ;;  %s647_s9 = smov 8  }
  0x11   : > { %437 = dma.hbm_to_vmem [thread:$0]  (!%p728_p6), %s169_s30, 512, %s171_s5, %s158_s7, %s646_s8, %s646_s8, %s647_s9  }
  0x12   : > { %s403_s10 = sadd.s32 4294967295, %s644_s17   ;;  %p72_p7 = scmp.ne.s32.totalorder %s628_s13, %s624_s12 }
  0x13   : > { %p737_p8 = scmp.eq.s32.totalorder %s403_s10, 0  ;;  %p404_p9 = scmp.ge.s32.totalorder %s644_s17, 1 }
  0x14   : > { %p132_p10 = scmp.lt.s32.totalorder %s644_s17, 3  ;;  %s144_s22 = sshll.u32 %s808_s0, 4  ;;  %s145_s22 = int_to_ptr.hbm [resolvable:$true] %s144_s22 }
  0x15   : > { %p745_p11 = por %p737_p8, %p72_p7  ;;  %s648_s24 = smov [#allocation4]  }
  0x16   : > { %p749_p12 = pnand %p404_p9, %p132_p10  ;;  %s146_s26 = sshll.u32 %s648_s24, 4  ;;  %s147_s26 = int_to_ptr.vmem [resolvable:$true] %s146_s26 }
  0x17   : > { %s187_s29 = scalar_lea.hbm %s810_s2, %s640_s16  ;;  %s183_s4 = scalar_lea.vmem [#allocation8], %s159_s23 }
  0x18   : > { %p430_p13 = pneg %p749_p12  ;;  %s189_s30 = sshll.u32 %s187_s29, 4  ;;  %s190_s30 = int_to_ptr.hbm [resolvable:$true] %s189_s30 }
  0x19   : > { %s191_s5 = sshll.u32 %s183_s4, 4  ;;  %200 = sbr.rel (%p749_p12) target bundleno = 227 (0xe3), region = 32  ;;  %s192_s5 = int_to_ptr.vmem [resolvable:$true] %s191_s5 }
  0x1a   : > { %p431_p0 = pnand %p430_p13, %p737_p8 }
  0x1b   : > { %440 = dma.hbm_to_vmem [thread:$0]  (!%p728_p6), %s190_s30, 16, %s192_s5, %s158_s7  }
  0x1c   : > { %433 = dma.hbm_to_vmem [thread:$0]  (!%p431_p0), %s145_s22, 128, %s147_s26, [#allocation5]  }
  0x1e   : > { %615 = dma.done.wait (%p737_p8), [#allocation5], 128  }
  0x1f   : > { %617 = vsyncadd (%p737_p8), [#allocation5], 4294967168  ;;  %s207_s8 = sand.u32 1, %s403_s10   ;;  %s209_s9 = sand.u32 1, %s628_s13  }
  0x20   : > { %s412_s23 = sshll.u32 %s209_s9, 5  ;;  %s208_s21 = scalar_lea.sflag [#allocation7], %s207_s8 }
  0x21   : > { %s211_s12 = scalar_lea.vmem [#allocation6], %s412_s23 }
  0x22   : > { %619 = dma.done.wait (%p745_p11), %s208_s21, 528  }
  0x23   : > { %621 = vsyncadd (%p745_p11), %s208_s21, 4294966768  ;;  %p243_p1 = scmp.eq.s32.totalorder %s636_s15, 0  ;;  %s220_s6 = scalar_lea.vmem [#allocation8], %s209_s9 }
  0x24   : > { %v249_v0 = vld [vmem:[#allocation4] sm:$0xff] (%p243_p1)  ;;  %vm250_vm0 = vcmask (%p243_p1), 261120  }
  0x25   : > { %248 = sbr.rel (!%p243_p1) target bundleno = 42 (0x2a), region = 48  ;;  %251 = vst.msk [vmem:[#allocation2] sm:$0xff] (%p243_p1), %vm250_vm0, %v249_v0 }
  0x2a PF: > { %v255_v1 = vld [vmem:[%s211_s12 + $0x18] sm:$0xff]  ;;  %v254_v2 = vld [vmem:[%s211_s12 + $0x10] sm:$0xff]  ;;  %v253_v3 = vld [vmem:[%s211_s12 + $0x8] sm:$0xff]  ;;  %vm261_vm1 = vcmask 261120   ;;  %p315_p2 = scmp.eq.s32.totalorder %s636_s15, 1 }
  0x2b   : > { %277 = vmatpush.msra.mxu0 %v255_v1  ;;  %v252_v4 = vld [vmem:[%s211_s12] sm:$0xff]  ;;  %v495_v6 = vld [vmem:[%s220_s6] ss:$0 sm:$0xff] }
  0x2c   : > { %v256_v5 = vld [vmem:[#allocation2] sm:$0xff] }
  0x2d   : > { %278 = vmatpush.msra.mxu0 %v254_v2 }
  0x2f   : > { %279 = vmatpush.msra.mxu0 %v253_v3 }
  0x31   : > { %280 = vmatpush.msra.mxu0 %v252_v4 }
  0x32   : > { %414 = vmatmul.msk.f32.vlgmr.msra.gmra.mxu0 %vm261_vm1, %v256_v5 }
  0xaf   : > { %v282_v7 = vpop.f32.mrf.mxu0 }
  0xb0   : > { %v283_v8 = vadd.f32 %v495_v6, %v282_v7 }
  0xb2   : > { %v415_v9 = vmul.f32 -1.442695, %v283_v8 }
  0xb4   : > { %496 = vpow2.f32 %v415_v9 }
  0xba   : > { %v497_v10 = vpop.eup %496 }
  0xbb   : > { %v288_v11 = vadd.f32 1.0, %v497_v10 }
  0xbd   : > { %498 = vrcp.f32 %v288_v11  ;;  %v300_v15 = vand.u32 2147483648, %v288_v11  ;;  %v298_v17 = vand.u32 2147483647, %v288_v11  ;;  %vm294_vm3 = vweird.f32 %v288_v11 }
  0xbf   : > { %v301_v19 = vor.u32 1.1754944e-38, %v300_v15  ;;  %vm299_vm5 = vcmp.eq.f32.partialorder %v298_v17, 8.507059e+37 }
  0xc3   : > { %v499_v12 = vpop.eup %498 }
  0xc4   : > { %v290_v13 = vmul.f32 %v499_v12, %v288_v11  ;;  %vm295_vm2 = vweird.f32 %v499_v12 }
  0xc5   : > { %vm296_vm4 = vmor %vm294_vm3, %vm295_vm2 }
  0xc6   : > { %v291_v14 = vsub.f32 1.0, %v290_v13 }
  0xc8   : > { %v292_v16 = vmul.f32 %v499_v12, %v291_v14 }
  0xca   : > { %v293_v18 = vadd.f32 %v499_v12, %v292_v16 }
  0xcc   : > { %v297_v20 = vsel %vm296_vm4, %v499_v12, %v293_v18 }
  0xcd   : > { %v302_v21 = vsel %vm299_vm5, %v301_v19, %v297_v20 }
  0xce   : > { %v304_v22 = vmul.f32 %v302_v21, %v283_v8 }
  0xd0   : > { %307 = vst.msk [vmem:[#allocation3] sm:$0xff] %vm261_vm1, %v304_v22 }
  0xd6   : > { %319 = sbr.rel (!%p315_p2) target bundleno = 227 (0xe3), region = 56 }
  0xd7   : > { %v312_v23 = vld [vmem:[#allocation3] sm:$0xff] }
  0xd8   : > { %v313_v24 = vadd.f32 %v312_v23, %v256_v5 }
  0xda   : > { %314 = vst.msk [vmem:[#allocation2] sm:$0xff] %vm261_vm1, %v313_v24 }
  0xe1   : > { %v320_v25 = vld [vmem:[#allocation2] sm:$0xff] }
  0xe2   : > { %321 = vst.msk [vmem:[%s811_s3] sm:$0xff] %vm261_vm1, %v320_v25 }
  0xe3 PF: > { %s17_s17 = sadd.s32 1, %s644_s17   ;;  %s817_s12 = smov %s628_s13 }
  0xe4   : > { %p14_p3 = scmp.ge.s32.totalorder %s17_s17, 4   ;;  %s818_s13 = smov %s632_s14 }
  0xe5   : > { %s819_s14 = smov %s717_s25  ;;  %s820_s15 = smov %s640_s16 }
  0xe6   : > { %s821_s16 = smov %s823_s18  ;;  %16 = sbr.rel (!%p14_p3) target bundleno = 5 (0x5), region = 97 }
  0xeb   :  { %333 = vsyncpa [#allocation5], 1 }
  0xec   :  { %335 = vsyncpa [#allocation5 + $0x1], 1 }
  0xed   :  { %336 = vsyncpa [#allocation7], 1 }
  0xee   :  { %338 = vsyncpa [#allocation7 + $0x1], 1 }

// kernel: medusa_head.3
= control target key start
LH: loop header
LB: loop body
LE: loop exit
PB: predicated region body
PF: predicated region fallthrough
CT: control target
= control target key end

     0   :  { %7 = vsyncpa [#allocation3], 0  ;;  %s160_s0 = inlined_call_operand.vmem [shape: f32[8,32], index: 0, kind: input, shape index: {}]   ;;  %s161_s1 = inlined_call_operand.hbm [shape: f32[32,128], index: 1, kind: input, shape index: {}]   ;;  %s162_s2 = inlined_call_operand.hbm [shape: f32[8,128], index: 2, kind: output, shape index: {}]  }
   0x1   :  { %8 = vsyncpa [#allocation4], 0  ;;  %s15_s11 = sshll.u32 %s161_s1, 4  ;;  %s132_s12 = smov [#allocation2]   ;;  %s16_s11 = int_to_ptr.hbm [resolvable:$true] %s15_s11 }
   0x2   :  { %s17_s13 = sshll.u32 %s132_s12, 4  ;;  %s133_s14 = smov 128   ;;  %s18_s13 = int_to_ptr.vmem [resolvable:$true] %s17_s13 }
   0x3   :  { %s134_s15 = smov 8  }
   0x4   :  { %23 = dma.hbm_to_vmem [thread:$0]  %s16_s11, 512, %s18_s13, [#allocation3], %s133_s14, %s133_s14, %s134_s15  }
   0x5   :  { %128 = dma.done.wait [#allocation3], 512  }
   0x6   :  { %129 = vsyncadd [#allocation3], 4294966784  ;;  %v31_v0 = vld [vmem:[#allocation2 + $0x18] sm:$0xff]  ;;  %v30_v1 = vld [vmem:[#allocation2 + $0x10] sm:$0xff]  ;;  %vm33_vm0 = vcmask 261120   ;;  %s135_s1 = smov [#allocation5]  }
   0x7   :  { %49 = vmatpush.msra.mxu0 %v31_v0  ;;  %v29_v2 = vld [vmem:[#allocation2 + $0x8] sm:$0xff]  ;;  %v28_v3 = vld [vmem:[#allocation2] sm:$0xff]  ;;  %s63_s18 = sshll.u32 %s135_s1, 4  ;;  %s65_s21 = sshll.u32 %s162_s2, 4  ;;  %s64_s18 = int_to_ptr.vmem [resolvable:$true] %s63_s18  ;;  %s66_s21 = int_to_ptr.hbm [resolvable:$true] %s65_s21 }
   0x8   :  { %v32_v4 = vld [vmem:[%s160_s0] sm:$0xff] }
   0x9   :  { %50 = vmatpush.msra.mxu0 %v30_v1 }
   0xb   :  { %51 = vmatpush.msra.mxu0 %v29_v2 }
   0xd   :  { %52 = vmatpush.msra.mxu0 %v28_v3 }
   0xe   :  { %75 = vmatmul.msk.f32.vlgmr.msra.gmra.mxu0 %vm33_vm0, %v32_v4 }
  0x8b   :  { %v54_v5 = vpop.f32.mrf.mxu0 }
  0x8c   :  { %57 = vst [vmem:[#allocation5] sm:$0xff] %v54_v5 }
  0x8d   :  { %68 = dma.vmem_to_hbm [thread:$0]  %s64_s18, 128, %s66_s21, [#allocation4]  }
  0x8e   :  { %130 = dma.done.wait [#allocation4], 128  }
  0x8f   :  { %131 = vsyncadd [#allocation4], 4294967168 }
  0x90   :  { %73 = vsyncpa [#allocation3], 1 }
  0x91   :  { %74 = vsyncpa [#allocation4], 1 }

</bundles_post_ra>
